<compile_context>
chip_gen: v6e
topology: v6e:2x2x1
jax: 0.10.0
libtpu: 0.0.40
codegen_flags: <defaults>
</compile_context>

<pallas_src>
import functools

import jax
import jax.numpy as jnp
from jax.experimental import pallas as pl
from jax.experimental.pallas import tpu as pltpu


def mlp_kernel(x_ref, w1_ref, b1_ref, w2_ref, b2_ref, w3_ref, b3_ref,
               w4_ref, b4_ref, o_ref):
    # Transposed activations: [features, batch_tile]; batch on the lane axis.
    # bf16 operands feed the MXU; accumulate / bias / ReLU in f32 on the VPU.
    h = jnp.dot(w1_ref[...], x_ref[...], preferred_element_type=jnp.float32)
    h = jnp.maximum(h + b1_ref[...], 0.0)
    h = jnp.dot(w2_ref[...], h.astype(jnp.bfloat16),
                preferred_element_type=jnp.float32)
    h = jnp.maximum(h + b2_ref[...], 0.0)
    h = jnp.dot(w3_ref[...], h.astype(jnp.bfloat16),
                preferred_element_type=jnp.float32)
    h = jnp.maximum(h + b3_ref[...], 0.0)
    h = jnp.dot(w4_ref[...], h.astype(jnp.bfloat16),
                preferred_element_type=jnp.float32)
    # [d_out, block_b]: full-width (unmasked) lane-dense store, no padding.
    o_ref[...] = (h + b4_ref[...]).astype(o_ref.dtype)


def _num_tensorcores():
    """Best-effort TensorCore count (v7x has 2 per chip; v5e/v6e have 1)."""
    try:
        kind = jax.devices()[0].device_kind.lower()
        return 2 if "v7" in kind else 1
    except Exception:
        return 1


def _vmem_capacity_bytes():
    """Generation-aware VMEM capacity; conservative fallback (v7x per-TC)."""
    try:
        return int(pltpu.get_tpu_info().vmem_capacity_bytes)
    except Exception:
        return 64 << 20


@functools.partial(jax.jit, static_argnames=("block_b",))
def mlp_forward(x, params, block_b=512):
    """Runs the fused MLP kernel; x is [B, d_in], params in PyTorch layout."""
    w1, b1, w2, b2, w3, b3, w4, b4 = params  # W=[out,in], b=[out]
    B, d_in = x.shape
    hidden = w1.shape[0]
    d_out = w4.shape[0]

    # ---- Wrapper-side prep: transpose once, bf16 matmul operands.
    xt = x.T.astype(jnp.bfloat16)                      # [d_in, B]
    ws = tuple(w.astype(jnp.bfloat16) for w in (w1, w2, w3, w4))
    bs = tuple(b.reshape(-1, 1).astype(jnp.float32) for b in (b1, b2, b3, b4))
    operands = (ws[0], bs[0], ws[1], bs[1], ws[2], bs[2], ws[3], bs[3])

    # ---- Batch-tile selection (Python ints at trace time).
    # Batch sits on the lane axis, so any tile narrower than the full batch
    # must be a multiple of 128 lanes; a full-extent tile may be any size.
    block_b = min(block_b, B)
    if block_b < B:
        block_b = ((block_b + 127) // 128) * 128
    if block_b >= B:
        block_b = B
        # Split across v7x's two TensorCores only when each half stays
        # lane-aligned; on single-TC chips (v5e/v6e) keep one grid step.
        if _num_tensorcores() > 1 and B >= 256 and B % 256 == 0:
            block_b = B // 2
    grid = (pl.cdiv(B, block_b),)

    def x_map(i):
        return (0, i)

    def rep_map(i):  # weights/biases identical for every batch tile
        return (0, 0)

    # NOTE: the 8 weight/bias operands are grid-invariant and tiny (~10 KiB);
    # default double-buffering is negligible here. For large hidden sizes,
    # switch them to pipeline_mode=pl.Buffered(1) or DMA once into scratch.
    in_specs = ([pl.BlockSpec((d_in, block_b), x_map)]
                + [pl.BlockSpec(a.shape, rep_map) for a in operands])
    out_specs = pl.BlockSpec((d_out, block_b), x_map)

    # ---- VMEM budget: double-buffered x/out tiles + weights + activations.
    x_bytes = d_in * block_b * 2                       # bf16 input tile
    out_bytes = d_out * block_b * 4                    # f32 output tile
    w_bytes = sum(a.size * a.dtype.itemsize for a in operands)
    act_bytes = 6 * hidden * block_b * 4               # in-flight activations
    vmem_limit = int(2 * (x_bytes + out_bytes + w_bytes) + act_bytes)
    vmem_limit = min(max(vmem_limit, 4 << 20), _vmem_capacity_bytes() // 2)

    out_t = pl.pallas_call(
        mlp_kernel,
        out_shape=jax.ShapeDtypeStruct((d_out, B), jnp.float32),
        grid_spec=pltpu.PrefetchScalarGridSpec(
            num_scalar_prefetch=0,
            grid=grid,
            in_specs=in_specs,
            out_specs=out_specs,
        ),
        compiler_params=pltpu.CompilerParams(
            dimension_semantics=("parallel",),
            vmem_limit_bytes=vmem_limit),
    )(xt, *operands)

    return out_t.T  # [B, d_out], f32


def init_params(key, input_layer, hidden_layer, output_layer):
    """PyTorch-style uniform(-1/sqrt(fan_in), 1/sqrt(fan_in)) init, [out,in]."""
    dims = [(hidden_layer, input_layer),
            (hidden_layer, hidden_layer),
            (hidden_layer, hidden_layer),
            (output_layer, hidden_layer)]
    params = []
    for fan_out, fan_in in dims:
        key, kw, kb = jax.random.split(key, 3)
        bound = 1.0 / jnp.sqrt(jnp.float32(fan_in))
        w = jax.random.uniform(kw, (fan_out, fan_in), jnp.float32, -bound, bound)
        b = jax.random.uniform(kb, (fan_out,), jnp.float32, -bound, bound)
        params += [w, b]
    return tuple(params)


def mlp_reference(x, params):
    """Pure f32 reference; kernel uses bf16 MXU operands so compare loosely."""
    w1, b1, w2, b2, w3, b3, w4, b4 = params
    h = jnp.maximum(x @ w1.T + b1, 0.0)
    h = jnp.maximum(h @ w2.T + b2, 0.0)
    h = jnp.maximum(h @ w3.T + b3, 0.0)
    return h @ w4.T + b4


if __name__ == "__main__":
    input_layer, hidden_layer, output_layer = 16, 32, 8
    batch = 256

    key = jax.random.PRNGKey(0)
    key, kx = jax.random.split(key)
    x = jax.random.normal(kx, (batch, input_layer), jnp.float32)
    params = init_params(key, input_layer, hidden_layer, output_layer)

    out = mlp_forward(x, params)
    out = jax.block_until_ready(out)

    ref = mlp_reference(x, params)
    assert out.shape == (batch, output_layer)
    # bf16 matmul operands -> relaxed tolerance vs the f32 reference.
    assert jnp.allclose(out, ref, atol=5e-2, rtol=5e-2), \
        float(jnp.abs(out - ref).max())

    print("KERNEL_OK")
</pallas_src>

<mosaic_0001>
module attributes {stable_mosaic.version = 11 : i64} {
  func.func @mlp_kernel(%arg0: i32, %arg1: memref<16x256xbf16, #tpu.memory_space<vmem>>, %arg2: memref<32x16xbf16, #tpu.memory_space<vmem>>, %arg3: memref<32x1xf32, #tpu.memory_space<vmem>>, %arg4: memref<32x32xbf16, #tpu.memory_space<vmem>>, %arg5: memref<32x1xf32, #tpu.memory_space<vmem>>, %arg6: memref<32x32xbf16, #tpu.memory_space<vmem>>, %arg7: memref<32x1xf32, #tpu.memory_space<vmem>>, %arg8: memref<8x32xbf16, #tpu.memory_space<vmem>>, %arg9: memref<8x1xf32, #tpu.memory_space<vmem>>, %arg10: memref<8x256xf32, #tpu.memory_space<vmem>>) attributes {dimension_semantics = [#tpu.dimension_semantics<parallel>], iteration_bounds = array<i64: 1>, scalar_prefetch = 0 : i64, scratch_operands = 0 : i64, tpu.core_type = #tpu.core_type<tc>, window_params = [{transform_indices = @transform_0, window_bounds = array<i64: 16, 256>}, {pipeline_mode = #tpu.pipeline_mode<synchronous>, transform_indices = @transform_1, window_bounds = array<i64: 32, 16>}, {pipeline_mode = #tpu.pipeline_mode<synchronous>, transform_indices = @transform_2, window_bounds = array<i64: 32, 1>}, {pipeline_mode = #tpu.pipeline_mode<synchronous>, transform_indices = @transform_3, window_bounds = array<i64: 32, 32>}, {pipeline_mode = #tpu.pipeline_mode<synchronous>, transform_indices = @transform_4, window_bounds = array<i64: 32, 1>}, {pipeline_mode = #tpu.pipeline_mode<synchronous>, transform_indices = @transform_5, window_bounds = array<i64: 32, 32>}, {pipeline_mode = #tpu.pipeline_mode<synchronous>, transform_indices = @transform_6, window_bounds = array<i64: 32, 1>}, {pipeline_mode = #tpu.pipeline_mode<synchronous>, transform_indices = @transform_7, window_bounds = array<i64: 8, 32>}, {pipeline_mode = #tpu.pipeline_mode<synchronous>, transform_indices = @transform_8, window_bounds = array<i64: 8, 1>}, {transform_indices = @transform_9, window_bounds = array<i64: 8, 256>}]} {
    %c0 = arith.constant 0 : index
    %c0_0 = arith.constant 0 : index
    %0 = vector.load %arg2[%c0, %c0_0] : memref<32x16xbf16, #tpu.memory_space<vmem>>, vector<32x16xbf16>
    %c0_1 = arith.constant 0 : index
    %c0_2 = arith.constant 0 : index
    %1 = vector.load %arg1[%c0_1, %c0_2] : memref<16x256xbf16, #tpu.memory_space<vmem>>, vector<16x256xbf16>
    %cst = arith.constant dense<0.000000e+00> : vector<32x256xf32>
    %2 = tpu.matmul %0, %1, %cst {dimension_numbers = #tpu.dot_dimension_numbers<[1], [0], [0], [1], [0, 0, 1, 1], [], []>} : vector<32x16xbf16>, vector<16x256xbf16>, vector<32x256xf32> -> vector<32x256xf32>
    %c0_3 = arith.constant 0 : index
    %c0_4 = arith.constant 0 : index
    %3 = vector.load %arg3[%c0_3, %c0_4] : memref<32x1xf32, #tpu.memory_space<vmem>>, vector<32x1xf32>
    %4 = vector.broadcast %3 : vector<32x1xf32> to vector<32x256xf32>
    %5 = arith.addf %2, %4 : vector<32x256xf32>
    %cst_5 = arith.constant 0.000000e+00 : f32
    %6 = vector.broadcast %cst_5 : f32 to vector<32x256xf32>
    %7 = arith.maximumf %5, %6 : vector<32x256xf32>
    %c0_6 = arith.constant 0 : index
    %c0_7 = arith.constant 0 : index
    %8 = vector.load %arg4[%c0_6, %c0_7] : memref<32x32xbf16, #tpu.memory_space<vmem>>, vector<32x32xbf16>
    %9 = arith.truncf %7 : vector<32x256xf32> to vector<32x256xbf16>
    %cst_8 = arith.constant dense<0.000000e+00> : vector<32x256xf32>
    %10 = tpu.matmul %8, %9, %cst_8 {dimension_numbers = #tpu.dot_dimension_numbers<[1], [0], [0], [1], [0, 0, 1, 1], [], []>} : vector<32x32xbf16>, vector<32x256xbf16>, vector<32x256xf32> -> vector<32x256xf32>
    %c0_9 = arith.constant 0 : index
    %c0_10 = arith.constant 0 : index
    %11 = vector.load %arg5[%c0_9, %c0_10] : memref<32x1xf32, #tpu.memory_space<vmem>>, vector<32x1xf32>
    %12 = vector.broadcast %11 : vector<32x1xf32> to vector<32x256xf32>
    %13 = arith.addf %10, %12 : vector<32x256xf32>
    %cst_11 = arith.constant 0.000000e+00 : f32
    %14 = vector.broadcast %cst_11 : f32 to vector<32x256xf32>
    %15 = arith.maximumf %13, %14 : vector<32x256xf32>
    %c0_12 = arith.constant 0 : index
    %c0_13 = arith.constant 0 : index
    %16 = vector.load %arg6[%c0_12, %c0_13] : memref<32x32xbf16, #tpu.memory_space<vmem>>, vector<32x32xbf16>
    %17 = arith.truncf %15 : vector<32x256xf32> to vector<32x256xbf16>
    %cst_14 = arith.constant dense<0.000000e+00> : vector<32x256xf32>
    %18 = tpu.matmul %16, %17, %cst_14 {dimension_numbers = #tpu.dot_dimension_numbers<[1], [0], [0], [1], [0, 0, 1, 1], [], []>} : vector<32x32xbf16>, vector<32x256xbf16>, vector<32x256xf32> -> vector<32x256xf32>
    %c0_15 = arith.constant 0 : index
    %c0_16 = arith.constant 0 : index
    %19 = vector.load %arg7[%c0_15, %c0_16] : memref<32x1xf32, #tpu.memory_space<vmem>>, vector<32x1xf32>
    %20 = vector.broadcast %19 : vector<32x1xf32> to vector<32x256xf32>
    %21 = arith.addf %18, %20 : vector<32x256xf32>
    %cst_17 = arith.constant 0.000000e+00 : f32
    %22 = vector.broadcast %cst_17 : f32 to vector<32x256xf32>
    %23 = arith.maximumf %21, %22 : vector<32x256xf32>
    %c0_18 = arith.constant 0 : index
    %c0_19 = arith.constant 0 : index
    %24 = vector.load %arg8[%c0_18, %c0_19] : memref<8x32xbf16, #tpu.memory_space<vmem>>, vector<8x32xbf16>
    %25 = arith.truncf %23 : vector<32x256xf32> to vector<32x256xbf16>
    %cst_20 = arith.constant dense<0.000000e+00> : vector<8x256xf32>
    %26 = tpu.matmul %24, %25, %cst_20 {dimension_numbers = #tpu.dot_dimension_numbers<[1], [0], [0], [1], [0, 0, 1, 1], [], []>} : vector<8x32xbf16>, vector<32x256xbf16>, vector<8x256xf32> -> vector<8x256xf32>
    %c0_21 = arith.constant 0 : index
    %c0_22 = arith.constant 0 : index
    %27 = vector.load %arg9[%c0_21, %c0_22] : memref<8x1xf32, #tpu.memory_space<vmem>>, vector<8x1xf32>
    %28 = vector.broadcast %27 : vector<8x1xf32> to vector<8x256xf32>
    %29 = arith.addf %26, %28 : vector<8x256xf32>
    %c0_23 = arith.constant 0 : index
    %c0_24 = arith.constant 0 : index
    %30 = vector.load %arg10[%c0_23, %c0_24] : memref<8x256xf32, #tpu.memory_space<vmem>>, vector<8x256xf32>
    tpu.vector_store %arg10[%c0_23, %c0_24], %29 {strides = array<i32>} : memref<8x256xf32, #tpu.memory_space<vmem>>, vector<8x256xf32>,
    return
  }
  func.func @transform_0(%arg0: i32) -> (i32, i32) {
    %c0_i32 = arith.constant 0 : i32
    %c0_i32_0 = arith.constant 0 : i32
    return %c0_i32, %arg0 : i32, i32
  }
  func.func @transform_1(%arg0: i32) -> (i32, i32) {
    %c0_i32 = arith.constant 0 : i32
    %c0_i32_0 = arith.constant 0 : i32
    %c0_i32_1 = arith.constant 0 : i32
    return %c0_i32, %c0_i32_0 : i32, i32
  }
  func.func @transform_2(%arg0: i32) -> (i32, i32) {
    %c0_i32 = arith.constant 0 : i32
    %c0_i32_0 = arith.constant 0 : i32
    %c0_i32_1 = arith.constant 0 : i32
    return %c0_i32, %c0_i32_0 : i32, i32
  }
  func.func @transform_3(%arg0: i32) -> (i32, i32) {
    %c0_i32 = arith.constant 0 : i32
    %c0_i32_0 = arith.constant 0 : i32
    %c0_i32_1 = arith.constant 0 : i32
    return %c0_i32, %c0_i32_0 : i32, i32
  }
  func.func @transform_4(%arg0: i32) -> (i32, i32) {
    %c0_i32 = arith.constant 0 : i32
    %c0_i32_0 = arith.constant 0 : i32
    %c0_i32_1 = arith.constant 0 : i32
    return %c0_i32, %c0_i32_0 : i32, i32
  }
  func.func @transform_5(%arg0: i32) -> (i32, i32) {
    %c0_i32 = arith.constant 0 : i32
    %c0_i32_0 = arith.constant 0 : i32
    %c0_i32_1 = arith.constant 0 : i32
    return %c0_i32, %c0_i32_0 : i32, i32
  }
  func.func @transform_6(%arg0: i32) -> (i32, i32) {
    %c0_i32 = arith.constant 0 : i32
    %c0_i32_0 = arith.constant 0 : i32
    %c0_i32_1 = arith.constant 0 : i32
    return %c0_i32, %c0_i32_0 : i32, i32
  }
  func.func @transform_7(%arg0: i32) -> (i32, i32) {
    %c0_i32 = arith.constant 0 : i32
    %c0_i32_0 = arith.constant 0 : i32
    %c0_i32_1 = arith.constant 0 : i32
    return %c0_i32, %c0_i32_0 : i32, i32
  }
  func.func @transform_8(%arg0: i32) -> (i32, i32) {
    %c0_i32 = arith.constant 0 : i32
    %c0_i32_0 = arith.constant 0 : i32
    %c0_i32_1 = arith.constant 0 : i32
    return %c0_i32, %c0_i32_0 : i32, i32
  }
  func.func @transform_9(%arg0: i32) -> (i32, i32) {
    %c0_i32 = arith.constant 0 : i32
    %c0_i32_0 = arith.constant 0 : i32
    return %c0_i32, %arg0 : i32, i32
  }
}

</mosaic_0001>

<bundles_post_ra>
// kernel: mlp_forward.1
= control target key start
LH: loop header
LB: loop body
LE: loop exit
PB: predicated region body
PF: predicated region fallthrough
CT: control target
= control target key end

     0   :  { %v492_v2 = vmov 0   ;;  %vm84_vm0 = vcmask 130048   ;;  %s629_s0 = inlined_call_operand.vmem [shape: bf16[16,256], index: 0, kind: input, shape index: {}]   ;;  %s630_s1 = inlined_call_operand.vmem [shape: bf16[32,16], index: 1, kind: input, shape index: {}]   ;;  %s631_s2 = inlined_call_operand.vmem [shape: f32[32,1], index: 2, kind: input, shape index: {}]   ;;  %s632_s3 = inlined_call_operand.vmem [shape: bf16[32,32], index: 3, kind: input, shape index: {}]   ;;  %s633_s4 = inlined_call_operand.vmem [shape: f32[32,1], index: 4, kind: input, shape index: {}]   ;;  %s634_s5 = inlined_call_operand.vmem [shape: bf16[32,32], index: 5, kind: input, shape index: {}]   ;;  %s635_s6 = inlined_call_operand.vmem [shape: f32[32,1], index: 6, kind: input, shape index: {}]   ;;  %s636_s7 = inlined_call_operand.vmem [shape: bf16[8,32], index: 7, kind: input, shape index: {}]   ;;  %s637_s8 = inlined_call_operand.vmem [shape: f32[8,1], index: 8, kind: input, shape index: {}]   ;;  %s638_s9 = inlined_call_operand.hbm [shape: f32[8,256], index: 9, kind: output, shape index: {}]  }
   0x1   :  { %v461_v0 = vld [vmem:[%s629_s0 + $0x4] ss:$8 sps:$4 sm:$0xff]   ;;  %v463_v1 = vld [vmem:[%s629_s0] ss:$8 sps:$4 sm:$0xff]   ;;  %123 = vmatprep.mubr.bf16.mxu0 %v492_v2  ;;  %459 = vset.pattern.permute.xlu0 %v492_v2  ;;  %v42_v4 = vld [vmem:[%s631_s2 + $0x10] sm:$0xff] }
   0x2   :  { %105 = vmatprep.subr.bf16.mxu0 %v461_v0  ;;  %v464_v3 = vld [vmem:[%s630_s1] sm:$0xff]   ;;  %460 = vset.pattern.permute.xlu1 %v492_v2  ;;  %v43_v6 = vld [vmem:[%s631_s2 + $0x18] sm:$0xff]  ;;  %v41_v7 = vld [vmem:[%s631_s2 + $0x8] sm:$0xff] }
   0x3   :  { %106 = vmatpush1.bf16.msra.mxu0 %v463_v1  ;;  %233 = vmatprep.mubr.bf16.mxu1 %v492_v2  ;;  %v40_v5 = vld [vmem:[%s631_s2] sm:$0xff]  ;;  %v162_v8 = vld [vmem:[%s633_s4 + $0x10] sm:$0xff]  ;;  %v465_v9 = vld [vmem:[%s630_s1 + $0x8] sm:$0xff]  }
   0x4   :  { %56 = vperm.xlu0 %459, %v42_v4   ;;  %46 = vperm.xlu1 %460, %v40_v5   ;;  %v163_v10 = vld [vmem:[%s633_s4 + $0x18] sm:$0xff] }
   0x6   :  { %446 = vmatmul.mubr.msk.bf16.vlgmr.msra.gmra.mxu0 %vm84_vm0, %v464_v3 }
   0x7   :  { %133 = vmatprep.mubr.bf16.mxu0 %v492_v2 }
   0x8   :  { %61 = vperm.xlu0 %459, %v43_v6   ;;  %51 = vperm.xlu1 %460, %v41_v7  }
   0x9   :  { %14 = vsyncpa [#allocation3], 0  ;;  %v160_v11 = vld [vmem:[%s633_s4] sm:$0xff]  ;;  %v161_v12 = vld [vmem:[%s633_s4 + $0x8] sm:$0xff]  ;;  %vm194_vm1 = vcmask 261120   ;;  %s493_s23 = smov [#allocation2]  }
   0xa   :  { %v272_v13 = vld [vmem:[%s635_s6 + $0x10] sm:$0xff]  ;;  %v273_v14 = vld [vmem:[%s635_s6 + $0x18] sm:$0xff]  ;;  %v270_v15 = vld [vmem:[%s635_s6] sm:$0xff]  ;;  %s434_s24 = sshll.u32 %s493_s23, 4  ;;  %s435_s24 = int_to_ptr.vmem [resolvable:$true] %s434_s24 }
   0xb   :  { %v271_v16 = vld [vmem:[%s635_s6 + $0x8] sm:$0xff]  ;;  %v376_v17 = vld [vmem:[%s637_s8] sm:$0xff]  ;;  %s470_s25 = scalar_lea.vmem %s435_s24, 256  ;;  %p475_p1 = scmp.lt.s32.totalorder %s435_s24, %s435_s24 }
   0xc   :  { %176 = vperm.xlu0 %459, %v162_v8   ;;  %181 = vperm.xlu1 %460, %v163_v10   ;;  %v466_v50 = vld [vmem:[%s632_s3] sm:$0xff]   ;;  %v467_v51 = vld [vmem:[%s632_s3 + $0x8] sm:$0xff]   ;;  %p471_p0 = scmp.ne.s32.totalorder %s435_s24, %s470_s25  ;;  %p476_p2 = scmp.lt.s32.totalorder %s470_s25, %s470_s25 }
   0xe   :  { %447 = vmatmul.mubr.msk.bf16.gmra.mxu0 %vm84_vm0, %v465_v9  ;;  %p477_p3 = por %p476_p2, %p475_p1 }
   0xf   :  { %342 = vmatprep.mubr.bf16.mxu0 %v492_v2 }
  0x10   :  { %166 = vperm.xlu0 %459, %v160_v11   ;;  %171 = vperm.xlu1 %460, %v161_v12   ;;  %p478_p4 = pnand %p477_p3, %p471_p0 }
  0x14   :  { %286 = vperm.xlu0 %459, %v272_v13   ;;  %291 = vperm.xlu1 %460, %v273_v14  }
  0x18   :  { %276 = vperm.xlu0 %459, %v270_v15   ;;  %281 = vperm.xlu1 %460, %v271_v16  }
  0x1c   :  { %379 = vperm.xlu0 %459, %v376_v17  }
  0x7f   :  { %v57_v21 = vpop.permute.xlu0 %56  ;;  %v47_v22 = vpop.permute.xlu1 %46 }
  0x83   :  { %v62_v26 = vpop.permute.xlu0 %61  ;;  %v52_v27 = vpop.permute.xlu1 %51 }
  0x87   :  { %v182_v55 = vpop.permute.xlu1 %181  ;;  %v177_v57 = vpop.permute.xlu0 %176 }
  0x8b   :  { %v172_v60 = vpop.permute.xlu1 %171  ;;  %v167_v1 = vpop.permute.xlu0 %166 }
  0xc6   :  { %v125_v18 = vpop.f32.mrf.mxu0 }
  0xc7   :  { %v126_v41 = vadd.f32 %v125_v18, %v47_v22 }
  0xc8   :  { %v127_v19 = vpop.f32.mrf.mxu0 }
  0xc9   :  { %v128_v34 = vadd.f32 %v127_v19, %v47_v22  ;;  %v144_v48 = vmax.f32 %v126_v41, 0.0  ;;  %v469_v22 = vld [vmem:[%s634_s5 + $0x8] sm:$0xff]  }
  0xca   :  { %v129_v20 = vpop.f32.mrf.mxu0 }
  0xcb   :  { %v130_v36 = vadd.f32 %v129_v20, %v52_v27  ;;  %v145_v43 = vmax.f32 %v128_v34, 0.0 }
  0xcc   :  { %v131_v23 = vpop.f32.mrf.mxu0 }
  0xcd   :  { %v132_v29 = vadd.f32 %v131_v23, %v52_v27  ;;  %v146_v45 = vmax.f32 %v130_v36, 0.0 }
  0xce   :  { %v135_v24 = vpop.f32.mrf.mxu0 }
  0xcf   :  { %v136_v32 = vadd.f32 %v135_v24, %v57_v21  ;;  %v147_v38 = vmax.f32 %v132_v29, 0.0  ;;  %v156_v49 = vpack.c.bf16 %v146_v45, %v144_v48 }
  0xd0   :  { %v137_v25 = vpop.f32.mrf.mxu0 }
  0xd1   :  { %v138_v30 = vadd.f32 %v137_v25, %v57_v21  ;;  %v148_v42 = vmax.f32 %v136_v32, 0.0  ;;  %v157_v47 = vpack.c.bf16 %v147_v38, %v145_v43  ;;  %v468_v21 = vld [vmem:[%s634_s5] sm:$0xff]  }
  0xd2   :  { %v139_v28 = vpop.f32.mrf.mxu0 }
  0xd3   :  { %v140_v31 = vadd.f32 %v139_v28, %v62_v26  ;;  %v149_v39 = vmax.f32 %v138_v30, 0.0  ;;  %v287_v28 = vpop.permute.xlu0 %286 }
  0xd4   :  { %v141_v33 = vpop.f32.mrf.mxu0 }
  0xd5   :  { %v142_v35 = vadd.f32 %v141_v33, %v62_v26  ;;  %v150_v37 = vmax.f32 %v140_v31, 0.0  ;;  %v292_v26 = vpop.permute.xlu1 %291 }
  0xd7   :  { %v151_v40 = vmax.f32 %v142_v35, 0.0  ;;  %v158_v46 = vpack.c.bf16 %v150_v37, %v148_v42 }
  0xd9   :  { %v159_v44 = vpack.c.bf16 %v151_v40, %v149_v39  ;;  %v282_v31 = vpop.permute.xlu1 %281 }
  0xdb   :  { %213 = vmatprep.subr.bf16.mxu1 %v159_v44 }
  0xdc   :  { %214 = vmatpush1.bf16.msra.mxu1 %v158_v46 }
  0xdd   :  { %215 = vmatprep.subr.bf16.mxu1 %v157_v47 }
  0xe0   :  { %216 = vmatpush1.bf16.msra.mxu1 %v156_v49 }
  0xe3   :  { %450 = vmatmul.mubr.msk.bf16.vlgmr.msra.gmra.mxu1 %vm194_vm1, %v466_v50 }
  0xe4   :  { %243 = vmatprep.mubr.bf16.mxu1 %v492_v2 }
  0xeb   :  { %451 = vmatmul.mubr.msk.bf16.gmra.mxu1 %vm194_vm1, %v467_v51 }
  0xec   :  { %417 = vmatprep.mubr.bf16.mxu1 %v492_v2 }
 0x1a3   :  { %v235_v52 = vpop.f32.mrf.mxu1 }
 0x1a4   :  { %v236_v12 = vadd.f32 %v235_v52, %v167_v1 }
 0x1a5   :  { %v237_v53 = vpop.f32.mrf.mxu1 }
 0x1a6   :  { %v238_v5 = vadd.f32 %v237_v53, %v167_v1  ;;  %v254_v19 = vmax.f32 %v236_v12, 0.0 }
 0x1a7   :  { %v239_v54 = vpop.f32.mrf.mxu1 }
 0x1a8   :  { %v240_v7 = vadd.f32 %v239_v54, %v172_v60  ;;  %v255_v14 = vmax.f32 %v238_v5, 0.0  ;;  %v371_v54 = vld [vmem:[%s636_s7] sm:$0xf] }
 0x1a9   :  { %v241_v56 = vpop.f32.mrf.mxu1 }
 0x1aa   :  { %v242_v62 = vadd.f32 %v241_v56, %v172_v60  ;;  %v256_v16 = vmax.f32 %v240_v7, 0.0 }
 0x1ab   :  { %v245_v58 = vpop.f32.mrf.mxu1 }
 0x1ac   :  { %v246_v3 = vadd.f32 %v245_v58, %v177_v57  ;;  %v257_v9 = vmax.f32 %v242_v62, 0.0  ;;  %v266_v20 = vpack.c.bf16 %v256_v16, %v254_v19 }
 0x1ad   :  { %v247_v59 = vpop.f32.mrf.mxu1 }
 0x1ae   :  { %v248_v63 = vadd.f32 %v247_v59, %v177_v57  ;;  %v258_v13 = vmax.f32 %v246_v3, 0.0  ;;  %v267_v18 = vpack.c.bf16 %v257_v9, %v255_v14 }
 0x1af   :  { %v249_v61 = vpop.f32.mrf.mxu1 }
 0x1b0   :  { %v250_v0 = vadd.f32 %v249_v61, %v182_v55  ;;  %v259_v10 = vmax.f32 %v248_v63, 0.0 }
 0x1b1   :  { %v251_v4 = vpop.f32.mrf.mxu1 }
 0x1b2   :  { %v252_v6 = vadd.f32 %v251_v4, %v182_v55  ;;  %v260_v8 = vmax.f32 %v250_v0, 0.0 }
 0x1b4   :  { %v261_v11 = vmax.f32 %v252_v6, 0.0  ;;  %v268_v17 = vpack.c.bf16 %v260_v8, %v258_v13 }
 0x1b6   :  { %v269_v15 = vpack.c.bf16 %v261_v11, %v259_v10 }
 0x1b8   :  { %322 = vmatprep.subr.bf16.mxu0 %v269_v15 }
 0x1b9   :  { %323 = vmatpush1.bf16.msra.mxu0 %v268_v17 }
 0x1ba   :  { %324 = vmatprep.subr.bf16.mxu0 %v267_v18 }
 0x1bd   :  { %325 = vmatpush1.bf16.msra.mxu0 %v266_v20 }
 0x1c0   :  { %454 = vmatmul.mubr.msk.bf16.vlgmr.msra.gmra.mxu0 %vm194_vm1, %v468_v21 }
 0x1c1   :  { %352 = vmatprep.mubr.bf16.mxu0 %v492_v2  ;;  %v277_v2 = vpop.permute.xlu0 %276 }
 0x1c5   :  { %v380_v55 = vpop.permute.xlu0 %379 }
 0x1c8   :  { %455 = vmatmul.mubr.msk.bf16.gmra.mxu0 %vm194_vm1, %v469_v22 }
 0x280   :  { %v344_v23 = vpop.f32.mrf.mxu0 }
 0x281   :  { %v345_v45 = vadd.f32 %v344_v23, %v277_v2 }
 0x282   :  { %v346_v24 = vpop.f32.mrf.mxu0 }
 0x283   :  { %v347_v38 = vadd.f32 %v346_v24, %v277_v2  ;;  %v363_v52 = vmax.f32 %v345_v45, 0.0 }
 0x284   :  { %v348_v25 = vpop.f32.mrf.mxu0 }
 0x285   :  { %v349_v40 = vadd.f32 %v348_v25, %v282_v31  ;;  %v364_v47 = vmax.f32 %v347_v38, 0.0 }
 0x286   :  { %v350_v27 = vpop.f32.mrf.mxu0 }
 0x287   :  { %v351_v33 = vadd.f32 %v350_v27, %v282_v31  ;;  %v365_v49 = vmax.f32 %v349_v40, 0.0 }
 0x288   :  { %v354_v29 = vpop.f32.mrf.mxu0 }
 0x289   :  { %v355_v36 = vadd.f32 %v354_v29, %v287_v28  ;;  %v366_v42 = vmax.f32 %v351_v33, 0.0  ;;  %v372_v53 = vpack.c.bf16 %v365_v49, %v363_v52 }
 0x28a   :  { %v356_v30 = vpop.f32.mrf.mxu0 }
 0x28b   :  { %v357_v34 = vadd.f32 %v356_v30, %v287_v28  ;;  %v367_v46 = vmax.f32 %v355_v36, 0.0  ;;  %v373_v51 = vpack.c.bf16 %v366_v42, %v364_v47 }
 0x28c   :  { %v358_v32 = vpop.f32.mrf.mxu0 }
 0x28d   :  { %v359_v35 = vadd.f32 %v358_v32, %v292_v26  ;;  %v368_v43 = vmax.f32 %v357_v34, 0.0 }
 0x28e   :  { %v360_v37 = vpop.f32.mrf.mxu0 }
 0x28f   :  { %v361_v39 = vadd.f32 %v360_v37, %v292_v26  ;;  %v369_v41 = vmax.f32 %v359_v35, 0.0 }
 0x291   :  { %v370_v44 = vmax.f32 %v361_v39, 0.0  ;;  %v374_v50 = vpack.c.bf16 %v369_v41, %v367_v46 }
 0x293   :  { %v375_v48 = vpack.c.bf16 %v370_v44, %v368_v43 }
 0x295   :  { %397 = vmatprep.subr.bf16.mxu1 %v375_v48 }
 0x296   :  { %398 = vmatpush1.bf16.msra.mxu1 %v374_v50 }
 0x297   :  { %399 = vmatprep.subr.bf16.mxu1 %v373_v51 }
 0x29a   :  { %400 = vmatpush1.bf16.msra.mxu1 %v372_v53 }
 0x29d   :  { %456 = vmatmul.mubr.msk.bf16.vlgmr.msra.gmra.mxu1 %vm194_vm1, %v371_v54 }
 0x35d   :  { %v419_v56 = vpop.f32.mrf.mxu1 }
 0x35e   :  { %v420_v57 = vadd.f32 %v419_v56, %v380_v55 }
 0x35f   :  { %v421_v58 = vpop.f32.mrf.mxu1 }
 0x360   :  { %426 = vst [vmem:[#allocation2] sm:$0xff] %v420_v57  ;;  %v422_v59 = vadd.f32 %v421_v58, %v380_v55 }
 0x361   :  { %v423_v60 = vpop.f32.mrf.mxu1 }
 0x362   :  { %427 = vst [vmem:[#allocation2 + $0x8] sm:$0xff] %v422_v59 }
 0x363   :  { %v424_v61 = vpop.f32.mrf.mxu1 }
 0x364   :  { %481 = shalt.err (!%p478_p4)
}
 0x365   :  { %437 = dma.vmem_to_hbm [thread:$0]  %s435_s24, 256, %s638_s9, [#allocation3]  }
 0x366   :  { %490 = dma.done.wait [#allocation3], 256  }
 0x367   :  { %491 = vsyncadd [#allocation3], 4294967040 }
 0x368   :  { %441 = vsyncpa [#allocation3], 1 }

</bundles_post_ra>
